<compile_context>
chip_gen: v6e
topology: v6e:2x2x1
jax: 0.10.0
libtpu: 0.0.40
codegen_flags: <defaults>
</compile_context>

<pallas_src>
import functools

import jax
import jax.numpy as jnp
from jax import lax
from jax.experimental import pallas as pl
from jax.experimental.pallas import tpu as pltpu


EPS = 1e-5
LANES = 128


def _round_up(x, m):
    return (x + m - 1) // m * m


def _const_spec(shape):
    # Weight/scale operand: same block every grid step -> stays VMEM-resident.
    return pl.BlockSpec(shape, lambda i: (0,) * len(shape))


# ----------------------------------------------------------------------------
# Kernel: per batch tile, fused  first_layer -> 2x ResLayer -> last_norm -> head
# ----------------------------------------------------------------------------
def resnet_kernel(x0_ref,
                  w0_ref, b0_ref,
                  wa1_ref, ba1_ref, wb1_ref, bb1_ref,
                  wa2_ref, ba2_ref, wb2_ref, bb2_ref,
                  sl_ref, tl_ref, wh_ref, bh_ref,
                  out_ref):
    def linear(h, w_ref, b_ref):
        # bf16 MXU operands, f32 accumulation; bias add in f32 on the VPU.
        return (jnp.dot(h.astype(w_ref.dtype), w_ref[...],
                        preferred_element_type=jnp.float32) + b_ref[...])

    def reslayer(z, wa_ref, ba_ref, wb_ref, bb_ref):
        # BatchNorm1d (eval) is folded into wa/ba at pack time: norm -> Linear -> ReLU
        h = jnp.maximum(linear(z, wa_ref, ba_ref), 0.0)
        # Linear (Dropout(p=0) = identity) + residual add
        return linear(h, wb_ref, bb_ref) + z

    # first_layer on concat([bag, x_num]) (single fused matmul, K padded to 8)
    x = linear(x0_ref[...], w0_ref, b0_ref)                  # (TB, Hp) f32

    x = reslayer(x, wa1_ref, ba1_ref, wb1_ref, bb1_ref)
    x = reslayer(x, wa2_ref, ba2_ref, wb2_ref, bb2_ref)

    # last_norm -> ReLU (scale/shift kept separate: ReLU sits before the head)
    x = jnp.maximum(x * sl_ref[...] + tl_ref[...], 0.0)

    # Head Linear(H -> 1): wh (8, Hp) contracted with x (TB, Hp) over Hp (the
    # splash-attention "NT" matmul form), so the logits arrive lane-dense as
    # row 0 of an (8, TB) MXU result — no (TB, 128) f32 writeback.
    head = lax.dot_general(wh_ref[...], x.astype(jnp.bfloat16),
                           dimension_numbers=(((1,), (1,)), ((), ())),
                           preferred_element_type=jnp.float32)   # (8, TB)
    out_ref[0] = head[0:1, :] + bh_ref[...]                      # (1, TB) f32


# ----------------------------------------------------------------------------
# Parameter init (PyTorch-shaped) and packing (pad / transpose / fold BN / bf16)
# ----------------------------------------------------------------------------
def _bn_init(h):
    return {"g": jnp.ones((h,), jnp.float32), "b": jnp.zeros((h,), jnp.float32),
            "mean": jnp.zeros((h,), jnp.float32), "var": jnp.ones((h,), jnp.float32)}


def init_params(key, cat_features, num_features, size_embedding, size_hidden,
                hidden_factor):
    V = cat_features + 1
    E, H = size_embedding, size_hidden
    R = size_hidden * hidden_factor
    ks = jax.random.split(key, 14)

    def rnd(k, shape, scale=0.1):
        return scale * jax.random.normal(k, shape, dtype=jnp.float32)

    emb_table = rnd(ks[0], (V, E)).at[0].set(0.0)            # padding_idx=0 row

    return {
        "emb_table": emb_table,
        # first_layer: Linear(E+N -> H), torch layout (out, in)
        "w0": rnd(ks[1], (H, E + num_features)), "b0": rnd(ks[2], (H,)),
        # ResLayer 1
        "bn1": _bn_init(H),
        "wa1": rnd(ks[3], (R, H)), "ba1": rnd(ks[4], (R,)),
        "wb1": rnd(ks[5], (H, R)), "bb1": rnd(ks[6], (H,)),
        # ResLayer 2
        "bn2": _bn_init(H),
        "wa2": rnd(ks[7], (R, H)), "ba2": rnd(ks[8], (R,)),
        "wb2": rnd(ks[9], (H, R)), "bb2": rnd(ks[10], (H,)),
        # last_norm + head Linear(H -> 1)
        "bnl": _bn_init(H),
        "wh": rnd(ks[11], (1, H)), "bh": rnd(ks[12], (1,)),
    }


def pack_params(p, num_features):
    """Pad feature dims, transpose weights, fold eval-mode BN, cast to bf16."""
    E = p["emb_table"].shape[1]
    H = p["b0"].shape[0]
    R = p["ba1"].shape[0]
    K = E + num_features
    # Keep the first-layer contraction pad minimal (x0 read is the main HBM
    # stream after the output restructure); only revisit if masked vlds show up.
    Kp = _round_up(K, 8)
    Hp = _round_up(H, LANES)
    Rp = _round_up(R, LANES)

    def lin(w, b, kp, np_):
        # torch (out, in) -> pre-transposed, zero-padded (in_pad, out_pad) bf16
        wt = jnp.pad(w.T, ((0, kp - w.shape[1]), (0, np_ - w.shape[0])))
        bp = jnp.pad(b[None, :], ((0, 0), (0, np_ - b.shape[0])))
        return wt.astype(jnp.bfloat16), bp.astype(jnp.float32)

    def lin_fold_bn(w, b, bn_d, kp, np_):
        # Eval-mode BN on the Linear's input, folded in exactly:
        #   (z*s + t) @ W^T + b  ==  z @ (s[:,None] * W^T) + (t @ W^T + b)
        s = bn_d["g"] * lax.rsqrt(bn_d["var"] + EPS)
        t = bn_d["b"] - bn_d["mean"] * s
        wt = w.T * s[:, None]                               # (in, out), rows scaled
        bf = b + t @ w.T                                     # (out,)
        wt = jnp.pad(wt, ((0, kp - wt.shape[0]), (0, np_ - wt.shape[1])))
        bp = jnp.pad(bf[None, :], ((0, 0), (0, np_ - bf.shape[0])))
        return wt.astype(jnp.bfloat16), bp.astype(jnp.float32)

    def bn(d, np_):
        scale = d["g"] * lax.rsqrt(d["var"] + EPS)
        shift = d["b"] - d["mean"] * scale
        pad = lambda v: jnp.pad(v[None, :], ((0, 0), (0, np_ - v.shape[0])))
        return pad(scale).astype(jnp.float32), pad(shift).astype(jnp.float32)

    w0, b0 = lin(p["w0"], p["b0"], Kp, Hp)
    wa1, ba1 = lin_fold_bn(p["wa1"], p["ba1"], p["bn1"], Hp, Rp)
    wb1, bb1 = lin(p["wb1"], p["bb1"], Rp, Hp)
    wa2, ba2 = lin_fold_bn(p["wa2"], p["ba2"], p["bn2"], Hp, Rp)
    wb2, bb2 = lin(p["wb2"], p["bb2"], Rp, Hp)
    sl, tl = bn(p["bnl"], Hp)
    # Head: (8, Hp) bf16 (row 0 = real weight, rows 1..7 zero -> MXU-friendly
    # sublane count, row 0 of the (8, TB) result is the logits); scalar bias.
    wh = jnp.pad(p["wh"], ((0, 8 - p["wh"].shape[0]), (0, Hp - H))).astype(jnp.bfloat16)
    bh = p["bh"].reshape(1, 1).astype(jnp.float32)

    return {
        "emb_table": p["emb_table"],
        "weights": (w0, b0, wa1, ba1, wb1, bb1, wa2, ba2, wb2, bb2,
                    sl, tl, wh, bh),
    }


# ----------------------------------------------------------------------------
# Forward wrapper
# ----------------------------------------------------------------------------
def _pick_tb(batch):
    """Rows per grid step (batch tile)."""
    if batch < 128:
        return _round_up(max(batch, 1), 8)
    # Large tiles amortize the ~0.35us/step grid overhead (the padded matmuls
    # are tiny), but keep >=2 grid steps so the "parallel" batch axis can shard
    # across v7x's two TensorCores.  1024 chosen from the 512-2048 sweep range.
    for tb in (1024, 512, 256, 128):
        if _round_up(batch, tb) // tb >= 2:
            return tb
    return 128


def resnet_forward(packed, x_cat, x_num):
    """x_cat: (B, L) int32 indices (0 = padding); x_num: (B, N) float32."""
    weights = packed["weights"]
    Kp = weights[0].shape[0]           # padded first-layer contraction dim
    B = x_cat.shape[0]

    # --- plain-JAX glue: EmbeddingBag(mode='mean', padding_idx=0) ------------
    # Only the reduced (B, E+N) rows reach the kernel.
    # TODO(synk): if the HLO materializes the (B, L, E) gather instead of fusing
    # it into the reduction, move the bag into the kernel (scalar-prefetched
    # x_cat + DMA row gather, or a one-hot (B,V)@(V,E) MXU matmul for small V).
    emb = jnp.take(packed["emb_table"], x_cat, axis=0)       # (B, L, E)
    mask = (x_cat != 0).astype(jnp.float32)                  # (B, L)
    summed = jnp.einsum("ble,bl->be", emb, mask)             # (B, E)
    cnt = jnp.sum(mask, axis=1, keepdims=True)               # (B, 1)
    bag = summed / jnp.maximum(cnt, 1.0)                     # empty bag -> 0

    x0 = jnp.concatenate([bag, x_num.astype(jnp.float32)], axis=1)   # (B, E+N)

    TB = _pick_tb(B)
    Bp = _round_up(B, TB)
    G = Bp // TB
    x0 = jnp.pad(x0, ((0, Bp - B), (0, Kp - x0.shape[1]))).astype(jnp.bfloat16)

    in_specs = [pl.BlockSpec((TB, Kp), lambda i: (i, 0))]
    in_specs += [_const_spec(w.shape) for w in weights]

    out = pl.pallas_call(
        resnet_kernel,
        grid=(G,),
        in_specs=in_specs,
        # Lane-dense (1, TB) logit row per grid step; trailing dims equal the
        # full array dims so the tiling constraint is trivially satisfied.
        out_specs=pl.BlockSpec((1, 1, TB), lambda i: (i, 0, 0)),
        out_shape=jax.ShapeDtypeStruct((G, 1, TB), jnp.float32),
        compiler_params=pltpu.CompilerParams(
            dimension_semantics=("parallel",),
            vmem_limit_bytes=32 * 1024 * 1024,
        ),
    )(x0, *weights)

    return out.reshape(-1)[:B]                               # (B,) logits


# ----------------------------------------------------------------------------
if __name__ == "__main__":
    # Small config: cat_features=20, num_features=4, size_embedding=32,
    #               size_hidden=32, num_layers=2, hidden_factor=1, dim_out=1.
    B, L = 2, 8
    cat_features, num_features = 20, 4
    size_embedding, size_hidden, hidden_factor = 32, 32, 1

    key = jax.random.PRNGKey(0)
    k_param, k_cat, k_num = jax.random.split(key, 3)

    raw = init_params(k_param, cat_features, num_features,
                      size_embedding, size_hidden, hidden_factor)
    packed = pack_params(raw, num_features)

    x_cat = jax.random.randint(k_cat, (B, L), 0, cat_features + 1,
                               dtype=jnp.int32)              # 0 acts as padding
    x_num = jax.random.normal(k_num, (B, num_features), dtype=jnp.float32)

    fwd = jax.jit(functools.partial(resnet_forward, packed))
    out = fwd(x_cat, x_num)
    jax.block_until_ready(out)
    assert out.shape == (B,) and out.dtype == jnp.float32
    print("KERNEL_OK")
</pallas_src>

<mosaic_0001>
module attributes {stable_mosaic.version = 11 : i64} {
  func.func @resnet_kernel(%arg0: i32, %arg1: memref<8x40xbf16, #tpu.memory_space<vmem>>, %arg2: memref<40x128xbf16, #tpu.memory_space<vmem>>, %arg3: memref<1x128xf32, #tpu.memory_space<vmem>>, %arg4: memref<128x128xbf16, #tpu.memory_space<vmem>>, %arg5: memref<1x128xf32, #tpu.memory_space<vmem>>, %arg6: memref<128x128xbf16, #tpu.memory_space<vmem>>, %arg7: memref<1x128xf32, #tpu.memory_space<vmem>>, %arg8: memref<128x128xbf16, #tpu.memory_space<vmem>>, %arg9: memref<1x128xf32, #tpu.memory_space<vmem>>, %arg10: memref<128x128xbf16, #tpu.memory_space<vmem>>, %arg11: memref<1x128xf32, #tpu.memory_space<vmem>>, %arg12: memref<1x128xf32, #tpu.memory_space<vmem>>, %arg13: memref<1x128xf32, #tpu.memory_space<vmem>>, %arg14: memref<8x128xbf16, #tpu.memory_space<vmem>>, %arg15: memref<1x1xf32, #tpu.memory_space<vmem>>, %arg16: memref<1x1x8xf32, #tpu.memory_space<vmem>>) attributes {dimension_semantics = [#tpu.dimension_semantics<parallel>], iteration_bounds = array<i64: 1>, scalar_prefetch = 0 : i64, scratch_operands = 0 : i64, tpu.core_type = #tpu.core_type<tc>, window_params = [{transform_indices = @transform_0, window_bounds = array<i64: 8, 40>}, {pipeline_mode = #tpu.pipeline_mode<synchronous>, transform_indices = @transform_1, window_bounds = array<i64: 40, 128>}, {pipeline_mode = #tpu.pipeline_mode<synchronous>, transform_indices = @transform_2, window_bounds = array<i64: 1, 128>}, {pipeline_mode = #tpu.pipeline_mode<synchronous>, transform_indices = @transform_3, window_bounds = array<i64: 128, 128>}, {pipeline_mode = #tpu.pipeline_mode<synchronous>, transform_indices = @transform_4, window_bounds = array<i64: 1, 128>}, {pipeline_mode = #tpu.pipeline_mode<synchronous>, transform_indices = @transform_5, window_bounds = array<i64: 128, 128>}, {pipeline_mode = #tpu.pipeline_mode<synchronous>, transform_indices = @transform_6, window_bounds = array<i64: 1, 128>}, {pipeline_mode = #tpu.pipeline_mode<synchronous>, transform_indices = @transform_7, window_bounds = array<i64: 128, 128>}, {pipeline_mode = #tpu.pipeline_mode<synchronous>, transform_indices = @transform_8, window_bounds = array<i64: 1, 128>}, {pipeline_mode = #tpu.pipeline_mode<synchronous>, transform_indices = @transform_9, window_bounds = array<i64: 128, 128>}, {pipeline_mode = #tpu.pipeline_mode<synchronous>, transform_indices = @transform_10, window_bounds = array<i64: 1, 128>}, {pipeline_mode = #tpu.pipeline_mode<synchronous>, transform_indices = @transform_11, window_bounds = array<i64: 1, 128>}, {pipeline_mode = #tpu.pipeline_mode<synchronous>, transform_indices = @transform_12, window_bounds = array<i64: 1, 128>}, {pipeline_mode = #tpu.pipeline_mode<synchronous>, transform_indices = @transform_13, window_bounds = array<i64: 8, 128>}, {pipeline_mode = #tpu.pipeline_mode<synchronous>, transform_indices = @transform_14, window_bounds = array<i64: 1, 1>}, {transform_indices = @transform_15, window_bounds = array<i64: 1, 1, 8>}]} {
    %c0 = arith.constant 0 : index
    %c0_0 = arith.constant 0 : index
    %0 = vector.load %arg1[%c0, %c0_0] : memref<8x40xbf16, #tpu.memory_space<vmem>>, vector<8x40xbf16>
    %c0_1 = arith.constant 0 : index
    %c0_2 = arith.constant 0 : index
    %1 = vector.load %arg2[%c0_1, %c0_2] : memref<40x128xbf16, #tpu.memory_space<vmem>>, vector<40x128xbf16>
    %cst = arith.constant dense<0.000000e+00> : vector<8x128xf32>
    %2 = tpu.matmul %0, %1, %cst {dimension_numbers = #tpu.dot_dimension_numbers<[1], [0], [0], [1], [0, 0, 1, 1], [], []>} : vector<8x40xbf16>, vector<40x128xbf16>, vector<8x128xf32> -> vector<8x128xf32>
    %c0_3 = arith.constant 0 : index
    %c0_4 = arith.constant 0 : index
    %3 = vector.load %arg3[%c0_3, %c0_4] : memref<1x128xf32, #tpu.memory_space<vmem>>, vector<1x128xf32>
    %4 = vector.broadcast %3 : vector<1x128xf32> to vector<8x128xf32>
    %5 = arith.addf %2, %4 : vector<8x128xf32>
    %6 = arith.truncf %5 : vector<8x128xf32> to vector<8x128xbf16>
    %c0_5 = arith.constant 0 : index
    %c0_6 = arith.constant 0 : index
    %7 = vector.load %arg4[%c0_5, %c0_6] : memref<128x128xbf16, #tpu.memory_space<vmem>>, vector<128x128xbf16>
    %cst_7 = arith.constant dense<0.000000e+00> : vector<8x128xf32>
    %8 = tpu.matmul %6, %7, %cst_7 {dimension_numbers = #tpu.dot_dimension_numbers<[1], [0], [0], [1], [0, 0, 1, 1], [], []>} : vector<8x128xbf16>, vector<128x128xbf16>, vector<8x128xf32> -> vector<8x128xf32>
    %c0_8 = arith.constant 0 : index
    %c0_9 = arith.constant 0 : index
    %9 = vector.load %arg5[%c0_8, %c0_9] : memref<1x128xf32, #tpu.memory_space<vmem>>, vector<1x128xf32>
    %10 = vector.broadcast %9 : vector<1x128xf32> to vector<8x128xf32>
    %11 = arith.addf %8, %10 : vector<8x128xf32>
    %cst_10 = arith.constant 0.000000e+00 : f32
    %12 = vector.broadcast %cst_10 : f32 to vector<8x128xf32>
    %13 = arith.maximumf %11, %12 : vector<8x128xf32>
    %14 = arith.truncf %13 : vector<8x128xf32> to vector<8x128xbf16>
    %c0_11 = arith.constant 0 : index
    %c0_12 = arith.constant 0 : index
    %15 = vector.load %arg6[%c0_11, %c0_12] : memref<128x128xbf16, #tpu.memory_space<vmem>>, vector<128x128xbf16>
    %cst_13 = arith.constant dense<0.000000e+00> : vector<8x128xf32>
    %16 = tpu.matmul %14, %15, %cst_13 {dimension_numbers = #tpu.dot_dimension_numbers<[1], [0], [0], [1], [0, 0, 1, 1], [], []>} : vector<8x128xbf16>, vector<128x128xbf16>, vector<8x128xf32> -> vector<8x128xf32>
    %c0_14 = arith.constant 0 : index
    %c0_15 = arith.constant 0 : index
    %17 = vector.load %arg7[%c0_14, %c0_15] : memref<1x128xf32, #tpu.memory_space<vmem>>, vector<1x128xf32>
    %18 = vector.broadcast %17 : vector<1x128xf32> to vector<8x128xf32>
    %19 = arith.addf %16, %18 : vector<8x128xf32>
    %20 = arith.addf %19, %5 : vector<8x128xf32>
    %21 = arith.truncf %20 : vector<8x128xf32> to vector<8x128xbf16>
    %c0_16 = arith.constant 0 : index
    %c0_17 = arith.constant 0 : index
    %22 = vector.load %arg8[%c0_16, %c0_17] : memref<128x128xbf16, #tpu.memory_space<vmem>>, vector<128x128xbf16>
    %cst_18 = arith.constant dense<0.000000e+00> : vector<8x128xf32>
    %23 = tpu.matmul %21, %22, %cst_18 {dimension_numbers = #tpu.dot_dimension_numbers<[1], [0], [0], [1], [0, 0, 1, 1], [], []>} : vector<8x128xbf16>, vector<128x128xbf16>, vector<8x128xf32> -> vector<8x128xf32>
    %c0_19 = arith.constant 0 : index
    %c0_20 = arith.constant 0 : index
    %24 = vector.load %arg9[%c0_19, %c0_20] : memref<1x128xf32, #tpu.memory_space<vmem>>, vector<1x128xf32>
    %25 = vector.broadcast %24 : vector<1x128xf32> to vector<8x128xf32>
    %26 = arith.addf %23, %25 : vector<8x128xf32>
    %cst_21 = arith.constant 0.000000e+00 : f32
    %27 = vector.broadcast %cst_21 : f32 to vector<8x128xf32>
    %28 = arith.maximumf %26, %27 : vector<8x128xf32>
    %29 = arith.truncf %28 : vector<8x128xf32> to vector<8x128xbf16>
    %c0_22 = arith.constant 0 : index
    %c0_23 = arith.constant 0 : index
    %30 = vector.load %arg10[%c0_22, %c0_23] : memref<128x128xbf16, #tpu.memory_space<vmem>>, vector<128x128xbf16>
    %cst_24 = arith.constant dense<0.000000e+00> : vector<8x128xf32>
    %31 = tpu.matmul %29, %30, %cst_24 {dimension_numbers = #tpu.dot_dimension_numbers<[1], [0], [0], [1], [0, 0, 1, 1], [], []>} : vector<8x128xbf16>, vector<128x128xbf16>, vector<8x128xf32> -> vector<8x128xf32>
    %c0_25 = arith.constant 0 : index
    %c0_26 = arith.constant 0 : index
    %32 = vector.load %arg11[%c0_25, %c0_26] : memref<1x128xf32, #tpu.memory_space<vmem>>, vector<1x128xf32>
    %33 = vector.broadcast %32 : vector<1x128xf32> to vector<8x128xf32>
    %34 = arith.addf %31, %33 : vector<8x128xf32>
    %35 = arith.addf %34, %20 : vector<8x128xf32>
    %c0_27 = arith.constant 0 : index
    %c0_28 = arith.constant 0 : index
    %36 = vector.load %arg12[%c0_27, %c0_28] : memref<1x128xf32, #tpu.memory_space<vmem>>, vector<1x128xf32>
    %37 = vector.broadcast %36 : vector<1x128xf32> to vector<8x128xf32>
    %38 = arith.mulf %35, %37 : vector<8x128xf32>
    %c0_29 = arith.constant 0 : index
    %c0_30 = arith.constant 0 : index
    %39 = vector.load %arg13[%c0_29, %c0_30] : memref<1x128xf32, #tpu.memory_space<vmem>>, vector<1x128xf32>
    %40 = vector.broadcast %39 : vector<1x128xf32> to vector<8x128xf32>
    %41 = arith.addf %38, %40 : vector<8x128xf32>
    %cst_31 = arith.constant 0.000000e+00 : f32
    %42 = vector.broadcast %cst_31 : f32 to vector<8x128xf32>
    %43 = arith.maximumf %41, %42 : vector<8x128xf32>
    %c0_32 = arith.constant 0 : index
    %c0_33 = arith.constant 0 : index
    %44 = vector.load %arg14[%c0_32, %c0_33] : memref<8x128xbf16, #tpu.memory_space<vmem>>, vector<8x128xbf16>
    %45 = arith.truncf %43 : vector<8x128xf32> to vector<8x128xbf16>
    %cst_34 = arith.constant dense<0.000000e+00> : vector<8x8xf32>
    %46 = tpu.matmul %44, %45, %cst_34 {dimension_numbers = #tpu.dot_dimension_numbers<[1], [1], [0], [0], [0, 0, 1, 0], [], []>} : vector<8x128xbf16>, vector<8x128xbf16>, vector<8x8xf32> -> vector<8x8xf32>
    %47 = vector.extract_strided_slice %46 {offsets = [0, 0], sizes = [1, 8], strides = [1, 1]} : vector<8x8xf32> to vector<1x8xf32>
    %c0_35 = arith.constant 0 : index
    %c0_36 = arith.constant 0 : index
    %48 = vector.load %arg15[%c0_35, %c0_36] : memref<1x1xf32, #tpu.memory_space<vmem>>, vector<1x1xf32>
    %49 = vector.broadcast %48 : vector<1x1xf32> to vector<1x8xf32>
    %50 = arith.addf %47, %49 : vector<1x8xf32>
    %c0_37 = arith.constant 0 : index
    %c0_38 = arith.constant 0 : index
    %c0_39 = arith.constant 0 : index
    %51 = vector.load %arg16[%c0_37, %c0_38, %c0_39] : memref<1x1x8xf32, #tpu.memory_space<vmem>>, vector<1x1x8xf32>
    %52 = vector.shape_cast %51 : vector<1x1x8xf32> to vector<1x8xf32>
    %53 = vector.shape_cast %50 : vector<1x8xf32> to vector<1x1x8xf32>
    tpu.vector_store %arg16[%c0_37, %c0_38, %c0_39], %53 {strides = array<i32>} : memref<1x1x8xf32, #tpu.memory_space<vmem>>, vector<1x1x8xf32>,
    return
  }
  func.func @transform_0(%arg0: i32) -> (i32, i32) {
    %c0_i32 = arith.constant 0 : i32
    %c0_i32_0 = arith.constant 0 : i32
    return %arg0, %c0_i32 : i32, i32
  }
  func.func @transform_1(%arg0: i32) -> (i32, i32) {
    %c0_i32 = arith.constant 0 : i32
    %c0_i32_0 = arith.constant 0 : i32
    %c0_i32_1 = arith.constant 0 : i32
    return %c0_i32, %c0_i32_0 : i32, i32
  }
  func.func @transform_2(%arg0: i32) -> (i32, i32) {
    %c0_i32 = arith.constant 0 : i32
    %c0_i32_0 = arith.constant 0 : i32
    %c0_i32_1 = arith.constant 0 : i32
    return %c0_i32, %c0_i32_0 : i32, i32
  }
  func.func @transform_3(%arg0: i32) -> (i32, i32) {
    %c0_i32 = arith.constant 0 : i32
    %c0_i32_0 = arith.constant 0 : i32
    %c0_i32_1 = arith.constant 0 : i32
    return %c0_i32, %c0_i32_0 : i32, i32
  }
  func.func @transform_4(%arg0: i32) -> (i32, i32) {
    %c0_i32 = arith.constant 0 : i32
    %c0_i32_0 = arith.constant 0 : i32
    %c0_i32_1 = arith.constant 0 : i32
    return %c0_i32, %c0_i32_0 : i32, i32
  }
  func.func @transform_5(%arg0: i32) -> (i32, i32) {
    %c0_i32 = arith.constant 0 : i32
    %c0_i32_0 = arith.constant 0 : i32
    %c0_i32_1 = arith.constant 0 : i32
    return %c0_i32, %c0_i32_0 : i32, i32
  }
  func.func @transform_6(%arg0: i32) -> (i32, i32) {
    %c0_i32 = arith.constant 0 : i32
    %c0_i32_0 = arith.constant 0 : i32
    %c0_i32_1 = arith.constant 0 : i32
    return %c0_i32, %c0_i32_0 : i32, i32
  }
  func.func @transform_7(%arg0: i32) -> (i32, i32) {
    %c0_i32 = arith.constant 0 : i32
    %c0_i32_0 = arith.constant 0 : i32
    %c0_i32_1 = arith.constant 0 : i32
    return %c0_i32, %c0_i32_0 : i32, i32
  }
  func.func @transform_8(%arg0: i32) -> (i32, i32) {
    %c0_i32 = arith.constant 0 : i32
    %c0_i32_0 = arith.constant 0 : i32
    %c0_i32_1 = arith.constant 0 : i32
    return %c0_i32, %c0_i32_0 : i32, i32
  }
  func.func @transform_9(%arg0: i32) -> (i32, i32) {
    %c0_i32 = arith.constant 0 : i32
    %c0_i32_0 = arith.constant 0 : i32
    %c0_i32_1 = arith.constant 0 : i32
    return %c0_i32, %c0_i32_0 : i32, i32
  }
  func.func @transform_10(%arg0: i32) -> (i32, i32) {
    %c0_i32 = arith.constant 0 : i32
    %c0_i32_0 = arith.constant 0 : i32
    %c0_i32_1 = arith.constant 0 : i32
    return %c0_i32, %c0_i32_0 : i32, i32
  }
  func.func @transform_11(%arg0: i32) -> (i32, i32) {
    %c0_i32 = arith.constant 0 : i32
    %c0_i32_0 = arith.constant 0 : i32
    %c0_i32_1 = arith.constant 0 : i32
    return %c0_i32, %c0_i32_0 : i32, i32
  }
  func.func @transform_12(%arg0: i32) -> (i32, i32) {
    %c0_i32 = arith.constant 0 : i32
    %c0_i32_0 = arith.constant 0 : i32
    %c0_i32_1 = arith.constant 0 : i32
    return %c0_i32, %c0_i32_0 : i32, i32
  }
  func.func @transform_13(%arg0: i32) -> (i32, i32) {
    %c0_i32 = arith.constant 0 : i32
    %c0_i32_0 = arith.constant 0 : i32
    %c0_i32_1 = arith.constant 0 : i32
    return %c0_i32, %c0_i32_0 : i32, i32
  }
  func.func @transform_14(%arg0: i32) -> (i32, i32) {
    %c0_i32 = arith.constant 0 : i32
    %c0_i32_0 = arith.constant 0 : i32
    %c0_i32_1 = arith.constant 0 : i32
    return %c0_i32, %c0_i32_0 : i32, i32
  }
  func.func @transform_15(%arg0: i32) -> (i32, i32, i32) {
    %c0_i32 = arith.constant 0 : i32
    %c0_i32_0 = arith.constant 0 : i32
    %c0_i32_1 = arith.constant 0 : i32
    return %arg0, %c0_i32, %c0_i32_0 : i32, i32, i32
  }
}

</mosaic_0001>

<bundles_post_ra>
// kernel: resnet_forward.1
= control target key start
LH: loop header
LB: loop body
LE: loop exit
PB: predicated region body
PF: predicated region fallthrough
CT: control target
= control target key end

     0   :  { %s1350_s0 = inlined_call_operand.vmem [shape: bf16[8,40], index: 0, kind: input, shape index: {}]   ;;  %s1351_s1 = inlined_call_operand.vmem [shape: bf16[40,128], index: 1, kind: input, shape index: {}]   ;;  %s1352_s2 = inlined_call_operand.vmem [shape: f32[1,128], index: 2, kind: input, shape index: {}]   ;;  %s1353_s3 = inlined_call_operand.vmem [shape: bf16[128,128], index: 3, kind: input, shape index: {}]   ;;  %s1354_s4 = inlined_call_operand.vmem [shape: f32[1,128], index: 4, kind: input, shape index: {}]   ;;  %s1355_s5 = inlined_call_operand.vmem [shape: bf16[128,128], index: 5, kind: input, shape index: {}]   ;;  %s1356_s6 = inlined_call_operand.hbm [shape: f32[1,128], index: 6, kind: input, shape index: {}]   ;;  %s1357_s7 = inlined_call_operand.vmem [shape: bf16[128,128], index: 7, kind: input, shape index: {}]   ;;  %s1358_s8 = inlined_call_operand.hbm [shape: f32[1,128], index: 8, kind: input, shape index: {}]   ;;  %s1359_s9 = inlined_call_operand.hbm [shape: bf16[128,128], index: 9, kind: input, shape index: {}]   ;;  %s1360_s10 = inlined_call_operand.hbm [shape: f32[1,128], index: 10, kind: input, shape index: {}]   ;;  %s1361_s11 = inlined_call_operand.hbm [shape: f32[1,128], index: 11, kind: input, shape index: {}]   ;;  %s1362_s12 = inlined_call_operand.vmem [shape: f32[1,128], index: 12, kind: input, shape index: {}]   ;;  %s1363_s13 = inlined_call_operand.hbm [shape: bf16[8,128], index: 13, kind: input, shape index: {}]   ;;  %s1364_s14 = inlined_call_operand.<no memory space> [shape: f32[1,1], index: 14, kind: input, shape index: {}]   ;;  %s1365_s15 = inlined_call_operand.vmem [shape: f32[1,1,8], index: 15, kind: output, shape index: {}]  }
   0x1   :  { %v20_v0 = vstv %s1364_s14 }
   0x2   :  { %21 = vst [vmem:[#allocation2] sm:$0x1] %v20_v0 }
   0x3   :  { %22 = vsyncpa [#allocation4], 0 }
   0x4   :  { %23 = vsyncpa [#allocation6], 0 }
   0x5   :  { %24 = vsyncpa [#allocation9], 0 }
   0x6   :  { %25 = vsyncpa [#allocation12], 0  ;;  %s1089_s20 = smov [#allocation5]   ;;  %s1090_s22 = smov [#allocation8]  }
   0x7   :  { %s56_s21 = sshll.u32 %s1089_s20, 4  ;;  %s78_s23 = sshll.u32 %s1090_s22, 4  ;;  %s57_s21 = int_to_ptr.vmem [resolvable:$true] %s56_s21  ;;  %s79_s23 = int_to_ptr.vmem [resolvable:$true] %s78_s23 }
   0x8   :  { %s969_s24 = scalar_lea.vmem %s57_s21, 16  ;;  %s973_s25 = scalar_lea.vmem %s57_s21, 32 }
   0x9   :  { %p970_p0 = scmp.ne.s32.totalorder %s57_s21, %s969_s24  ;;  %p974_p1 = scmp.lt.s32.totalorder %s57_s21, %s57_s21 }
   0xa   :  { %p975_p2 = scmp.lt.s32.totalorder %s973_s25, %s969_s24 }
   0xc   :  { %p976_p3 = por %p975_p2, %p974_p1 }
   0xe   :  { %p977_p4 = pnand %p976_p3, %p970_p0 }
  0x10   :  { %980 = shalt.err (!%p977_p4)
}
  0x11   :  { %59 = dma.hbm_to_vmem [thread:$0]  %s1358_s8, 16, %s57_s21, [#allocation6]  }
  0x12   :  { %s989_s27 = scalar_lea.vmem %s79_s23, 16  ;;  %s993_s28 = scalar_lea.vmem %s79_s23, 32 }
  0x13   :  { %p990_p5 = scmp.ne.s32.totalorder %s79_s23, %s989_s27  ;;  %p994_p6 = scmp.lt.s32.totalorder %s79_s23, %s79_s23 }
  0x14   :  { %p995_p7 = scmp.lt.s32.totalorder %s993_s28, %s989_s27 }
  0x16   :  { %p996_p8 = por %p995_p7, %p994_p6 }
  0x18   :  { %p997_p9 = pnand %p996_p8, %p990_p5 }
  0x1a   :  { %1000 = shalt.err (!%p997_p9)
}
  0x1b   :  { %81 = dma.hbm_to_vmem [thread:$0]  %s1360_s10, 16, %s79_s23, [#allocation9]  }
  0x1c   :  { %s1091_s16 = smov [#allocation3]   ;;  %s1092_s18 = smov [#allocation7]  }
  0x1d   :  { %s44_s17 = sshll.u32 %s1091_s16, 4  ;;  %s65_s19 = sshll.u32 %s1092_s18, 4  ;;  %s45_s17 = int_to_ptr.vmem [resolvable:$true] %s44_s17  ;;  %s66_s19 = int_to_ptr.vmem [resolvable:$true] %s65_s19 }
  0x1e   :  { %s1009_s20 = scalar_lea.vmem %s45_s17, 16  ;;  %s1013_s8 = scalar_lea.vmem %s45_s17, 32 }
  0x1f   :  { %p1010_p10 = scmp.ne.s32.totalorder %s45_s17, %s1009_s20  ;;  %p1014_p11 = scmp.lt.s32.totalorder %s45_s17, %s45_s17 }
  0x20   :  { %p1015_p12 = scmp.lt.s32.totalorder %s1013_s8, %s1009_s20 }
  0x22   :  { %p1016_p13 = por %p1015_p12, %p1014_p11 }
  0x24   :  { %p1017_p0 = pnand %p1016_p13, %p1010_p10 }
  0x26   :  { %1020 = shalt.err (!%p1017_p0)
}
  0x27   :  { %47 = dma.hbm_to_vmem [thread:$0]  %s1356_s6, 16, %s45_s17, [#allocation4]  }
  0x28   :  { %s1029_s24 = scalar_lea.vmem %s66_s19, 1024  ;;  %p1034_p2 = scmp.lt.s32.totalorder %s66_s19, %s66_s19 }
  0x29   :  { %p1030_p1 = scmp.ne.s32.totalorder %s66_s19, %s1029_s24  ;;  %p1035_p3 = scmp.lt.s32.totalorder %s1029_s24, %s1029_s24 }
  0x2b   :  { %p1036_p4 = por %p1035_p3, %p1034_p2 }
  0x2d   :  { %p1037_p5 = pnand %p1036_p4, %p1030_p1 }
  0x2f   :  { %1040 = shalt.err (!%p1037_p5)
}
  0x30   :  { %s1093_s10 = smov 64   ;;  %s1094_s23 = smov 4  }
  0x31   :  { %71 = dma.hbm_to_vmem [thread:$0]  %s1359_s9, 1024, %s66_s19, [#allocation6], %s1093_s10, %s1093_s10, %s1094_s23  }
  0x32   :  { %s1095_s26 = smov [#allocation10]   ;;  %s1096_s28 = smov [#allocation11]  }
  0x33   :  { %s88_s27 = sshll.u32 %s1095_s26, 4  ;;  %s100_s29 = sshll.u32 %s1096_s28, 4  ;;  %s89_s27 = int_to_ptr.vmem [resolvable:$true] %s88_s27  ;;  %s101_s29 = int_to_ptr.vmem [resolvable:$true] %s100_s29 }
  0x34   :  { %s1049_s6 = scalar_lea.vmem %s89_s27, 16  ;;  %s1053_s30 = scalar_lea.vmem %s89_s27, 32 }
  0x35   :  { %p1050_p6 = scmp.ne.s32.totalorder %s89_s27, %s1049_s6  ;;  %p1054_p7 = scmp.lt.s32.totalorder %s89_s27, %s89_s27 }
  0x36   :  { %p1055_p8 = scmp.lt.s32.totalorder %s1053_s30, %s1049_s6 }
  0x38   :  { %p1056_p9 = por %p1055_p8, %p1054_p7 }
  0x3a   :  { %p1057_p10 = pnand %p1056_p9, %p1050_p6 }
  0x3c   :  { %1060 = shalt.err (!%p1057_p10)
}
  0x3d   :  { %91 = dma.hbm_to_vmem [thread:$0]  %s1361_s11, 16, %s89_s27, [#allocation9]  }
  0x3e   :  { %s1069_s18 = scalar_lea.vmem %s101_s29, 64  ;;  %p1074_p12 = scmp.lt.s32.totalorder %s101_s29, %s101_s29 }
  0x3f   :  { %p1070_p11 = scmp.ne.s32.totalorder %s101_s29, %s1069_s18  ;;  %p1075_p13 = scmp.lt.s32.totalorder %s1069_s18, %s1069_s18 }
  0x41   :  { %p1076_p0 = por %p1075_p13, %p1074_p12 }
  0x43   :  { %p1077_p1 = pnand %p1076_p0, %p1070_p11 }
  0x45   :  { %1080 = shalt.err (!%p1077_p1)
}
  0x46   :  { %103 = dma.hbm_to_vmem [thread:$0]  %s1363_s13, 64, %s101_s29, [#allocation12]  }
  0x47   :  { %1081 = dma.done.wait [#allocation4], 16  }
  0x48   :  { %1082 = vsyncadd [#allocation4], 4294967280 }
  0x49   :  { %1083 = dma.done.wait [#allocation6], 1040  }
  0x4a   :  { %1084 = vsyncadd [#allocation6], 4294966256 }
  0x4b   :  { %1085 = dma.done.wait [#allocation9], 32  }
  0x4c   :  { %1086 = vsyncadd [#allocation9], 4294967264 }
  0x4d   :  { %1087 = dma.done.wait [#allocation12], 64  }
  0x4e   :  { %1088 = vsyncadd [#allocation12], 4294967232  ;;  %v1097_v1 = vmov 0.0   ;;  %vm1098_vm0 = vmmov 0   ;;  %vm157_vm1 = vcmask 1043456   ;;  %v927_v4 = vld [vmem:[%s1351_s1 + $0x8] sm:$0xff]  }
  0x4f   :  { %818 = vmatprep.subr.bf16.mxu0 %v1097_v1  ;;  %824 = vmatprep.mubr.msk.bf16.mxu0 %vm1098_vm0, %v1097_v1  ;;  %v926_v2 = vld [vmem:[%s1351_s1 + $0x10] ss:$0 sps:$4 sm:$0xff]   ;;  %v929_v5 = vld [vmem:[%s1353_s3 + $0x38] sm:$0xff]   ;;  %v928_v7 = vld [vmem:[%s1351_s1] sm:$0xff]   ;;  %vm153_vm2 = vcmask 326656   ;;  %vm723_vm3 = vcmask 57344  }
  0x50   :  { %828 = vmatprep.subr.bf16.mxu1 %v1097_v1  ;;  %844 = vmatprep.mubr.msk.bf16.mxu1 %vm1098_vm0, %v1097_v1  ;;  %v159_v3 = vsel %vm157_vm1, %v926_v2, 0  ;;  %v930_v6 = vld [vmem:[%s1353_s3 + $0x30] sm:$0xff]   ;;  %v931_v8 = vld [vmem:[%s1353_s3 + $0x28] sm:$0xff]   ;;  %v125_v9 = vld [vmem:[%s1350_s0] sm:$0xf] }
  0x51   :  { %819 = vmatpush3.bf16.msra.mxu0 %v159_v3  ;;  %829 = vmatpush3.bf16.msra.mxu1 %v929_v5  ;;  %v932_v10 = vld [vmem:[%s1353_s3 + $0x20] sm:$0xff]   ;;  %v933_v11 = vld [vmem:[%s1353_s3 + $0x18] sm:$0xff]   ;;  %v934_v12 = vld [vmem:[%s1353_s3 + $0x10] sm:$0xff]  }
  0x52   :  { %820 = vmatprep.subr.bf16.mxu0 %v1097_v1  ;;  %830 = vmatprep.subr.bf16.mxu1 %v1097_v1  ;;  %v935_v13 = vld [vmem:[%s1353_s3 + $0x8] sm:$0xff]   ;;  %v936_v14 = vld [vmem:[%s1353_s3] sm:$0xff]   ;;  %v937_v15 = vld [vmem:[%s1355_s5 + $0x38] sm:$0xff]  }
  0x53   :  { %v938_v16 = vld [vmem:[%s1355_s5 + $0x30] sm:$0xff]   ;;  %v939_v17 = vld [vmem:[%s1355_s5 + $0x28] sm:$0xff]   ;;  %v940_v18 = vld [vmem:[%s1355_s5 + $0x20] sm:$0xff]  }
  0x54   :  { %v941_v19 = vld [vmem:[%s1355_s5 + $0x18] sm:$0xff]   ;;  %v942_v20 = vld [vmem:[%s1355_s5 + $0x10] sm:$0xff]   ;;  %v733_v21 = vld [vmem:[%s1352_s2] ss:$0 sm:$0xff] }
  0x55   :  { %821 = vmatpush3.bf16.msra.mxu0 %v927_v4  ;;  %831 = vmatpush3.bf16.msra.mxu1 %v930_v6  ;;  %v943_v28 = vld [vmem:[%s1355_s5 + $0x8] sm:$0xff]   ;;  %v944_v29 = vld [vmem:[%s1355_s5] sm:$0xff]   ;;  %v945_v30 = vld [vmem:[%s1357_s7 + $0x38] sm:$0xff]  }
  0x56   :  { %822 = vmatprep.subr.bf16.mxu0 %v1097_v1  ;;  %832 = vmatprep.subr.bf16.mxu1 %v1097_v1  ;;  %v946_v31 = vld [vmem:[%s1357_s7 + $0x30] sm:$0xff]   ;;  %v947_v32 = vld [vmem:[%s1357_s7 + $0x28] sm:$0xff]   ;;  %v948_v33 = vld [vmem:[%s1357_s7 + $0x20] sm:$0xff]  }
  0x57   :  { %v949_v34 = vld [vmem:[%s1357_s7 + $0x18] sm:$0xff]   ;;  %v950_v35 = vld [vmem:[%s1357_s7 + $0x10] sm:$0xff]   ;;  %v738_v36 = vld [vmem:[%s1354_s4] ss:$0 sm:$0xff] }
  0x58   :  { %v951_v44 = vld [vmem:[%s1357_s7 + $0x8] sm:$0xff]   ;;  %v952_v45 = vld [vmem:[%s1357_s7] sm:$0xff]   ;;  %v954_v47 = vld [vmem:[#allocation7 + $0x30] sm:$0xff]  }
  0x59   :  { %823 = vmatpush3.bf16.msra.mxu0 %v928_v7  ;;  %833 = vmatpush3.bf16.msra.mxu1 %v931_v8  ;;  %v953_v46 = vld [vmem:[#allocation7 + $0x38] sm:$0xff]   ;;  %v955_v48 = vld [vmem:[#allocation7 + $0x28] sm:$0xff]   ;;  %v956_v49 = vld [vmem:[#allocation7 + $0x20] sm:$0xff]   ;;  %v1099_v8 = vmov 0  }
  0x5a   :  { %848 = vmatprep.subr.bf16.mxu0 %v1097_v1  ;;  %834 = vmatprep.subr.bf16.mxu1 %v1097_v1  ;;  %v957_v50 = vld [vmem:[#allocation7 + $0x18] sm:$0xff]   ;;  %v958_v51 = vld [vmem:[#allocation7 + $0x10] sm:$0xff]   ;;  %v959_v60 = vld [vmem:[#allocation7 + $0x8] sm:$0xff]  }
  0x5b   :  { %v747_v52 = vld [vmem:[#allocation3] ss:$0 sm:$0xff]  ;;  %v960_v61 = vld [vmem:[#allocation7] sm:$0xff]   ;;  %v756_v62 = vld [vmem:[#allocation5] ss:$0 sm:$0xff]  ;;  %925 = vset.pattern.permute.xlu0 %v1099_v8 }
  0x5c   :  { %825 = vmatmul.mubr.msk.bf16.vlgmr.msra.gmra.mxu0 %vm153_vm2, %v125_v9  ;;  %v712_v7 = vld [vmem:[#allocation2] sm:$0x1]  ;;  %v765_v9 = vld [vmem:[#allocation8] ss:$0 sm:$0xff] }
  0x5d   :  { %864 = vmatprep.mubr.msk.bf16.mxu0 %vm1098_vm0, %v1097_v1  ;;  %835 = vmatpush3.bf16.msra.mxu1 %v932_v10 }
  0x5e   :  { %836 = vmatprep.subr.bf16.mxu1 %v1097_v1  ;;  %849 = vmatpush3.bf16.msra.mxu0 %v937_v15 }
  0x5f   :  { %850 = vmatprep.subr.bf16.mxu0 %v1097_v1  ;;  %715 = vperm.xlu0 %925, %v712_v7  }
  0x61   :  { %837 = vmatpush3.bf16.msra.mxu1 %v933_v11 }
  0x62   :  { %838 = vmatprep.subr.bf16.mxu1 %v1097_v1  ;;  %851 = vmatpush3.bf16.msra.mxu0 %v938_v16 }
  0x63   :  { %852 = vmatprep.subr.bf16.mxu0 %v1097_v1 }
  0x65   :  { %839 = vmatpush3.bf16.msra.mxu1 %v934_v12  ;;  %v774_v12 = vld [vmem:[#allocation10] ss:$0 sm:$0xff] }
  0x66   :  { %840 = vmatprep.subr.bf16.mxu1 %v1097_v1  ;;  %853 = vmatpush3.bf16.msra.mxu0 %v939_v17 }
  0x67   :  { %854 = vmatprep.subr.bf16.mxu0 %v1097_v1 }
  0x69   :  { %841 = vmatpush3.bf16.msra.mxu1 %v935_v13 }
  0x6a   :  { %842 = vmatprep.subr.bf16.mxu1 %v1097_v1  ;;  %855 = vmatpush3.bf16.msra.mxu0 %v940_v18 }
  0x6b   :  { %856 = vmatprep.subr.bf16.mxu0 %v1097_v1 }
  0x6d   :  { %843 = vmatpush3.bf16.msra.mxu1 %v936_v14  ;;  %v775_v14 = vld [vmem:[%s1362_s12] ss:$0 sm:$0xff] }
  0x6e   :  { %868 = vmatprep.subr.bf16.mxu1 %v1097_v1  ;;  %857 = vmatpush3.bf16.msra.mxu0 %v941_v19 }
  0x6f   :  { %858 = vmatprep.subr.bf16.mxu0 %v1097_v1 }
  0x72   :  { %859 = vmatpush3.bf16.msra.mxu0 %v942_v20 }
  0x73   :  { %860 = vmatprep.subr.bf16.mxu0 %v1097_v1 }
  0x76   :  { %861 = vmatpush3.bf16.msra.mxu0 %v943_v28 }
  0x77   :  { %862 = vmatprep.subr.bf16.mxu0 %v1097_v1 }
  0x7a   :  { %863 = vmatpush3.bf16.msra.mxu0 %v944_v29 }
  0x7b   :  { %888 = vmatprep.subr.bf16.mxu0 %v1097_v1 }
 0x11c   :  { %v195_v22 = vpop.f32.mrf.mxu0 }
 0x11d   :  { %v1283_v23 = vadd.f32 %v733_v21, %v195_v22  ;;  %v670_v21 = vld [vmem:[#allocation11] sm:$0xf]  ;;  %v718_v22 = vlaneseq }
 0x11e   :  { %v826_v24 = vpop.f32.mrf.mxu0 }
 0x11f   :  { %v201_v25 = vpack.c.bf16 %v1283_v23, %v1283_v23 }
 0x120   :  { %v198_v26 = vpop.f32.mrf.mxu0 }
 0x121   :  { %845 = vmatmul.mubr.bf16.vlgmr.msra.gmra.mxu1 %v201_v25  ;;  %v716_v25 = vpop.permute.xlu0 %715 }
 0x122   :  { %v827_v27 = vpop.f32.mrf.mxu0  ;;  %884 = vmatprep.mubr.msk.bf16.mxu1 %vm1098_vm0, %v1097_v1  ;;  %869 = vmatpush3.bf16.msra.mxu1 %v945_v30 }
 0x123   :  { %870 = vmatprep.subr.bf16.mxu1 %v1097_v1 }
 0x126   :  { %871 = vmatpush3.bf16.msra.mxu1 %v946_v31 }
 0x127   :  { %872 = vmatprep.subr.bf16.mxu1 %v1097_v1 }
 0x12a   :  { %873 = vmatpush3.bf16.msra.mxu1 %v947_v32 }
 0x12b   :  { %874 = vmatprep.subr.bf16.mxu1 %v1097_v1 }
 0x12e   :  { %875 = vmatpush3.bf16.msra.mxu1 %v948_v33 }
 0x12f   :  { %876 = vmatprep.subr.bf16.mxu1 %v1097_v1 }
 0x132   :  { %877 = vmatpush3.bf16.msra.mxu1 %v949_v34 }
 0x133   :  { %878 = vmatprep.subr.bf16.mxu1 %v1097_v1 }
 0x136   :  { %879 = vmatpush3.bf16.msra.mxu1 %v950_v35 }
 0x137   :  { %880 = vmatprep.subr.bf16.mxu1 %v1097_v1 }
 0x13a   :  { %881 = vmatpush3.bf16.msra.mxu1 %v951_v44 }
 0x13b   :  { %882 = vmatprep.subr.bf16.mxu1 %v1097_v1 }
 0x13e   :  { %883 = vmatpush3.bf16.msra.mxu1 %v952_v45 }
 0x13f   :  { %908 = vmatprep.subr.bf16.mxu1 %v1097_v1 }
 0x1e1   :  { %v307_v37 = vpop.f32.mrf.mxu1 }
 0x1e2   :  { %v308_v38 = vadd.f32 %v738_v36, %v307_v37 }
 0x1e3   :  { %v846_v39 = vpop.f32.mrf.mxu1 }
 0x1e4   :  { %v313_v40 = vmax.f32 %v308_v38, 0.0 }
 0x1e5   :  { %v310_v41 = vpop.f32.mrf.mxu1 }
 0x1e6   :  { %v314_v42 = vpack.c.bf16 %v313_v40, %v313_v40 }
 0x1e7   :  { %v847_v43 = vpop.f32.mrf.mxu1 }
 0x1e8   :  { %865 = vmatmul.mubr.bf16.vlgmr.msra.gmra.mxu0 %v314_v42 }
 0x1e9   :  { %904 = vmatprep.mubr.msk.bf16.mxu0 %vm1098_vm0, %v1097_v1  ;;  %889 = vmatpush3.bf16.msra.mxu0 %v953_v46 }
 0x1ea   :  { %890 = vmatprep.subr.bf16.mxu0 %v1097_v1 }
 0x1ed   :  { %891 = vmatpush3.bf16.msra.mxu0 %v954_v47 }
 0x1ee   :  { %892 = vmatprep.subr.bf16.mxu0 %v1097_v1 }
 0x1f1   :  { %893 = vmatpush3.bf16.msra.mxu0 %v955_v48 }
 0x1f2   :  { %894 = vmatprep.subr.bf16.mxu0 %v1097_v1 }
 0x1f5   :  { %895 = vmatpush3.bf16.msra.mxu0 %v956_v49 }
 0x1f6   :  { %896 = vmatprep.subr.bf16.mxu0 %v1097_v1 }
 0x1f9   :  { %897 = vmatpush3.bf16.msra.mxu0 %v957_v50 }
 0x1fa   :  { %898 = vmatprep.subr.bf16.mxu0 %v1097_v1 }
 0x1fd   :  { %899 = vmatpush3.bf16.msra.mxu0 %v958_v51 }
 0x1fe   :  { %900 = vmatprep.subr.bf16.mxu0 %v1097_v1 }
 0x201   :  { %901 = vmatpush3.bf16.msra.mxu0 %v959_v60 }
 0x202   :  { %902 = vmatprep.subr.bf16.mxu0 %v1097_v1 }
 0x205   :  { %903 = vmatpush3.bf16.msra.mxu0 %v960_v61 }
 0x2a8   :  { %v420_v53 = vpop.f32.mrf.mxu0 }
 0x2a9   :  { %v421_v54 = vadd.f32 %v747_v52, %v420_v53 }
 0x2aa   :  { %v866_v55 = vpop.f32.mrf.mxu0 }
 0x2ab   :  { %v426_v56 = vadd.f32 %v421_v54, %v1283_v23  ;;  %v719_v23 = vshrl.u32 %v718_v22, 7 }
 0x2ac   :  { %v423_v57 = vpop.f32.mrf.mxu0 }
 0x2ad   :  { %v427_v58 = vpack.c.bf16 %v426_v56, %v426_v56  ;;  %v720_v24 = vsub.s32 0, %v719_v23 }
 0x2ae   :  { %v867_v59 = vpop.f32.mrf.mxu0 }
 0x2af   :  { %885 = vmatmul.mubr.bf16.vlgmr.msra.gmra.mxu1 %v427_v58  ;;  %v721_v26 = vrot.slane %v716_v25, %v720_v24 }
 0x2b0   :  { %910 = vmatprep.mubr.msk.bf16.mxu1 %vm1098_vm0, %v1097_v1 }
 0x36f   :  { %v533_v63 = vpop.f32.mrf.mxu1 }
 0x370   :  { %v534_v0 = vadd.f32 %v756_v62, %v533_v63 }
 0x371   :  { %v886_v2 = vpop.f32.mrf.mxu1 }
 0x372   :  { %v539_v3 = vmax.f32 %v534_v0, 0.0 }
 0x373   :  { %v536_v4 = vpop.f32.mrf.mxu1 }
 0x374   :  { %v540_v5 = vpack.c.bf16 %v539_v3, %v539_v3 }
 0x375   :  { %v887_v6 = vpop.f32.mrf.mxu1 }
 0x376   :  { %905 = vmatmul.mubr.bf16.vlgmr.msra.gmra.mxu0 %v540_v5 }
 0x436   :  { %v646_v10 = vpop.f32.mrf.mxu0 }
 0x437   :  { %v647_v11 = vadd.f32 %v765_v9, %v646_v10 }
 0x438   :  { %v906_v1 = vpop.f32.mrf.mxu0 }
 0x439   :  { %v652_v13 = vadd.f32 %v647_v11, %v426_v56 }
 0x43a   :  { %v649_v15 = vpop.f32.mrf.mxu0 }
 0x43b   :  { %v660_v16 = vmul.f32 %v774_v12, %v652_v13 }
 0x43c   :  { %v907_v17 = vpop.f32.mrf.mxu0 }
 0x43d   :  { %v668_v18 = vadd.f32 %v775_v14, %v660_v16 }
 0x43f   :  { %v669_v19 = vmax.f32 %v668_v18, 0.0 }
 0x441   :  { %v671_v20 = vpack.c.bf16 %v669_v19, %v669_v19 }
 0x443   :  { %909 = vmatpush3.bf16.xpose.msra.mxu1 %v671_v20 }
 0x44a   :  { %911 = vmatmul.mubr.bf16.vlgmr.msra.gmra.mxu1 %v670_v21 }
 0x50a   :  { %v706_v27 = vpop.f32.mrf.mxu1 }
 0x50b   :  { %v722_v28 = vadd.f32 %v721_v26, %v706_v27 }
 0x50c   :  { %v912_v29 = vpop.f32.mrf.mxu1 }
 0x50d   :  { %724 = vst.msk [vmem:[%s1365_s15] sm:$0x1] %vm723_vm3, %v722_v28 }
 0x50e   :  { %v709_v30 = vpop.f32.mrf.mxu1 }
 0x510   :  { %v913_v31 = vpop.f32.mrf.mxu1 }
 0x511   :  { %729 = vsyncpa [#allocation4], 1 }
 0x512   :  { %730 = vsyncpa [#allocation6], 1 }
 0x513   :  { %731 = vsyncpa [#allocation9], 1 }
 0x514   :  { %732 = vsyncpa [#allocation12], 1 }

</bundles_post_ra>
